<compile_context>
chip_gen: v7x
topology: tpu7x:2x2x1
jax: 0.10.0
libtpu: 0.0.40
codegen_flags: <defaults>
</compile_context>

<pallas_src>
import functools

import jax
import jax.numpy as jnp
import numpy as np
from jax.experimental import pallas as pl
from jax.experimental.pallas import tpu as pltpu


def _round_up(x, m):
    return ((x + m - 1) // m) * m


def _make_decoder_kernel(num_hidden, compute_dtype):
    """Fused decoder kernel: `num_hidden` (Linear+ReLU) layers + final Linear+Sigmoid."""

    def kernel(x_ref, *refs):
        hidden_refs = refs[:2 * num_hidden]
        wl_ref, bl_ref, out_ref, h_ref = refs[2 * num_hidden:]

        # The hidden stack is computed once per row tile (at column tile 0) and cached
        # in VMEM scratch; every column tile of the (large) final layer reuses it.
        @pl.when(pl.program_id(1) == 0)
        def _():
            h = x_ref[...]                                  # (block_rows, d_in) f32
            for l in range(num_hidden):
                w = hidden_refs[2 * l][...]                 # (d_l, d_{l+1}) compute_dtype
                b = hidden_refs[2 * l + 1][...]             # (1, d_{l+1}) f32
                y = jnp.dot(h.astype(compute_dtype), w,
                            preferred_element_type=jnp.float32) + b
                h = jnp.maximum(y, 0.0)                     # dropout (eval) == identity
            h_ref[...] = h

        y = jnp.dot(h_ref[...].astype(compute_dtype), wl_ref[...],
                    preferred_element_type=jnp.float32) + bl_ref[...]
        out_ref[...] = jax.nn.sigmoid(y).astype(out_ref.dtype)

    return kernel


@functools.partial(jax.jit,
                   static_argnames=("block_rows", "block_cols", "compute_dtype"))
def dyngraph2vec_dec_forward(dyn_emb, weights, biases, *,
                             block_rows=256, block_cols=512,
                             compute_dtype=jnp.float32):
    """dyngraph2vec decoder forward pass as a fused Pallas TPU kernel.

    dyn_emb : [N, dec_dims[0]]                       (any N; padded internally)
    weights : list of [dec_dims[l], dec_dims[l+1]]   (y = x @ W + b layout)
    biases  : list of [1, dec_dims[l+1]]
    returns : [N, dec_dims[-1]] float32
    """
    num_layers = len(weights)
    assert num_layers >= 1
    num_hidden = num_layers - 1
    n, d_in = dyn_emb.shape
    d_hid, d_out = weights[-1].shape

    # ---- tiling (rows: multiple of 8; cols: multiple of 128 -> lane-dense stores) ----
    block_rows = _round_up(max(8, min(block_rows, _round_up(n, 8))), 8)
    n_pad = _round_up(n, block_rows)
    bc = _round_up(min(block_cols, _round_up(d_out, 128)), 128)
    d_out_pad = _round_up(d_out, bc)
    grid = (n_pad // block_rows, d_out_pad // bc)

    # ---- pad inputs / cast params at the boundary ----
    x = dyn_emb.astype(jnp.float32)
    if n_pad != n:
        x = jnp.pad(x, ((0, n_pad - n), (0, 0)))
    w_hidden = [w.astype(compute_dtype) for w in weights[:-1]]
    b_hidden = [b.astype(jnp.float32) for b in biases[:-1]]
    w_last = weights[-1].astype(compute_dtype)
    b_last = biases[-1].astype(jnp.float32)
    if d_out_pad != d_out:
        w_last = jnp.pad(w_last, ((0, 0), (0, d_out_pad - d_out)))
        b_last = jnp.pad(b_last, ((0, 0), (0, d_out_pad - d_out)))

    # ---- BlockSpecs ----
    in_specs = [pl.BlockSpec((block_rows, d_in), lambda i, j: (i, 0))]
    flat_params = []
    for w, b in zip(w_hidden, b_hidden):
        # Hidden-layer params are small: whole-array blocks, loop-invariant index map.
        in_specs.append(pl.BlockSpec(w.shape, lambda i, j: (0, 0)))
        in_specs.append(pl.BlockSpec(b.shape, lambda i, j: (0, 0)))
        flat_params += [w, b]
    # Final layer: column-tiled along grid axis 1 (never fully resident in VMEM).
    in_specs.append(pl.BlockSpec((d_hid, bc), lambda i, j: (0, j)))
    in_specs.append(pl.BlockSpec((1, bc), lambda i, j: (0, j)))
    flat_params += [w_last, b_last]

    out_spec = pl.BlockSpec((block_rows, bc), lambda i, j: (i, j))

    # ---- scheduler hints: cost estimate + VMEM budget ----
    itemsize = int(np.dtype(compute_dtype).itemsize)
    n_col_tiles = grid[1]
    hidden_mac = sum(int(w.shape[0]) * int(w.shape[1]) for w in w_hidden)
    flops = 2 * n_pad * (hidden_mac * n_col_tiles + d_hid * d_out_pad)
    param_bytes = (sum(int(w.size) for w in w_hidden) + int(w_last.size)) * itemsize \
        + (sum(int(b.size) for b in b_hidden) + int(b_last.size)) * 4
    bytes_accessed = 4 * n_pad * (d_in + d_out_pad) + param_bytes
    cost = pl.CostEstimate(flops=int(flops),
                           transcendentals=int(n_pad * d_out_pad),
                           bytes_accessed=int(bytes_accessed))

    vmem_bytes = (
        2 * block_rows * d_in * 4                                     # x tiles
        + 2 * sum(int(w.size) for w in w_hidden) * itemsize           # hidden weights
        + 2 * sum(8 * _round_up(int(b.shape[1]), 128) for b in b_hidden) * 4
        + 2 * d_hid * bc * itemsize                                   # final-weight tiles
        + 2 * 8 * bc * 4                                              # final-bias tiles
        + 2 * block_rows * bc * 4                                     # output tiles
        + block_rows * d_hid * 4                                      # hidden scratch
    )
    vmem_limit = int(min(max(2 * vmem_bytes, 32 * 1024 * 1024), 64 * 1024 * 1024))

    kernel = _make_decoder_kernel(num_hidden, compute_dtype)

    out = pl.pallas_call(
        kernel,
        out_shape=jax.ShapeDtypeStruct((n_pad, d_out_pad), jnp.float32),
        grid_spec=pltpu.PrefetchScalarGridSpec(
            num_scalar_prefetch=0,
            grid=grid,
            in_specs=in_specs,
            out_specs=out_spec,
            scratch_shapes=[pltpu.VMEM((block_rows, d_hid), jnp.float32)],
        ),
        compiler_params=pltpu.CompilerParams(
            dimension_semantics=("parallel", "arbitrary"),
            vmem_limit_bytes=vmem_limit,
        ),
        cost_estimate=cost,
    )(x, *flat_params)

    return out[:n, :d_out]


def init_params(key, dec_dims):
    """Deterministic parameter init (uniform, PyTorch-Linear-like fan-in bound)."""
    weights, biases = [], []
    for l in range(len(dec_dims) - 1):
        fan_in, fan_out = dec_dims[l], dec_dims[l + 1]
        bound = 1.0 / jnp.sqrt(fan_in)
        key, kw, kb = jax.random.split(key, 3)
        w = jax.random.uniform(kw, (fan_in, fan_out), jnp.float32, -bound, bound)
        b = jax.random.uniform(kb, (1, fan_out), jnp.float32, -bound, bound)
        weights.append(w)
        biases.append(b)
    return weights, biases


def reference_forward(dyn_emb, weights, biases):
    """Pure-JAX reference mirroring the PyTorch forward (dropout in eval mode)."""
    h = dyn_emb
    for l in range(len(weights) - 1):
        h = jnp.maximum(h @ weights[l] + biases[l], 0.0)
    return jax.nn.sigmoid(h @ weights[-1] + biases[-1])


if __name__ == "__main__":
    key = jax.random.PRNGKey(0)

    # Case 1: shapes consistent with the module (dec_dims=[32, 64, 128], batch=16).
    dec_dims = [32, 64, 128]
    batch = 16
    key, kx, kp = jax.random.split(key, 3)
    dyn_emb = jax.random.normal(kx, (batch, dec_dims[0]), jnp.float32)
    weights, biases = init_params(kp, dec_dims)
    out = jax.block_until_ready(dyngraph2vec_dec_forward(dyn_emb, weights, biases))
    ref = reference_forward(dyn_emb, weights, biases)
    assert out.shape == (batch, dec_dims[-1])
    assert jnp.allclose(out, ref, atol=2e-5, rtol=2e-5), "case 1 mismatch vs reference"

    # Case 2: ragged batch + non-128-multiple node count -> exercises row/column
    # padding and the column-tiled final layer (grid = (2, 3)).
    dec_dims2 = [32, 64, 300]
    batch2 = 300
    key, kx2, kp2 = jax.random.split(key, 3)
    dyn_emb2 = jax.random.normal(kx2, (batch2, dec_dims2[0]), jnp.float32)
    weights2, biases2 = init_params(kp2, dec_dims2)
    out2 = jax.block_until_ready(
        dyngraph2vec_dec_forward(dyn_emb2, weights2, biases2, block_cols=128))
    ref2 = reference_forward(dyn_emb2, weights2, biases2)
    assert out2.shape == (batch2, dec_dims2[-1])
    assert jnp.allclose(out2, ref2, atol=2e-5, rtol=2e-5), "case 2 mismatch vs reference"

    print("KERNEL_OK")
</pallas_src>

<mosaic_0001>
module attributes {stable_mosaic.version = 11 : i64} {
  func.func @kernel(%arg0: i32, %arg1: i32, %arg2: memref<16x32xf32, #tpu.memory_space<vmem>>, %arg3: memref<32x64xf32, #tpu.memory_space<vmem>>, %arg4: memref<1x64xf32, #tpu.memory_space<vmem>>, %arg5: memref<64x128xf32, #tpu.memory_space<vmem>>, %arg6: memref<1x128xf32, #tpu.memory_space<vmem>>, %arg7: memref<16x128xf32, #tpu.memory_space<vmem>>, %arg8: memref<16x64xf32, #tpu.memory_space<vmem>>) attributes {dimension_semantics = [#tpu.dimension_semantics<parallel>, #tpu.dimension_semantics<arbitrary>], iteration_bounds = array<i64: 1, 1>, scalar_prefetch = 0 : i64, scratch_operands = 1 : i64, tpu.core_type = #tpu.core_type<tc>, window_params = [{transform_indices = @transform_0, window_bounds = array<i64: 16, 32>}, {pipeline_mode = #tpu.pipeline_mode<synchronous>, transform_indices = @transform_1, window_bounds = array<i64: 32, 64>}, {pipeline_mode = #tpu.pipeline_mode<synchronous>, transform_indices = @transform_2, window_bounds = array<i64: 1, 64>}, {transform_indices = @transform_3, window_bounds = array<i64: 64, 128>}, {transform_indices = @transform_4, window_bounds = array<i64: 1, 128>}, {transform_indices = @transform_5, window_bounds = array<i64: 16, 128>}]} {
    %c0_i32 = arith.constant 0 : i32
    %0 = arith.cmpi eq, %arg1, %c0_i32 : i32
    %1 = arith.extui %0 : i1 to i32
    %c0_i32_0 = arith.constant 0 : i32
    %2 = arith.cmpi ne, %1, %c0_i32_0 : i32
    scf.if %2 {
      %c0_9 = arith.constant 0 : index
      %c0_10 = arith.constant 0 : index
      %15 = vector.load %arg2[%c0_9, %c0_10] : memref<16x32xf32, #tpu.memory_space<vmem>>, vector<16x32xf32>
      %c0_11 = arith.constant 0 : index
      %c0_12 = arith.constant 0 : index
      %16 = vector.load %arg3[%c0_11, %c0_12] : memref<32x64xf32, #tpu.memory_space<vmem>>, vector<32x64xf32>
      %c0_13 = arith.constant 0 : index
      %c0_14 = arith.constant 0 : index
      %17 = vector.load %arg4[%c0_13, %c0_14] : memref<1x64xf32, #tpu.memory_space<vmem>>, vector<1x64xf32>
      %cst_15 = arith.constant dense<0.000000e+00> : vector<16x64xf32>
      %18 = tpu.matmul %15, %16, %cst_15 {dimension_numbers = #tpu.dot_dimension_numbers<[1], [0], [0], [1], [0, 0, 1, 1], [], []>} : vector<16x32xf32>, vector<32x64xf32>, vector<16x64xf32> -> vector<16x64xf32>
      %19 = vector.broadcast %17 : vector<1x64xf32> to vector<16x64xf32>
      %20 = arith.addf %18, %19 : vector<16x64xf32>
      %cst_16 = arith.constant 0.000000e+00 : f32
      %21 = vector.broadcast %cst_16 : f32 to vector<16x64xf32>
      %22 = arith.maximumf %20, %21 : vector<16x64xf32>
      %c0_17 = arith.constant 0 : index
      %c0_18 = arith.constant 0 : index
      %23 = vector.load %arg8[%c0_17, %c0_18] : memref<16x64xf32, #tpu.memory_space<vmem>>, vector<16x64xf32>
      tpu.vector_store %arg8[%c0_17, %c0_18], %22 {strides = array<i32>} : memref<16x64xf32, #tpu.memory_space<vmem>>, vector<16x64xf32>,
    } else {
    }
    %c0 = arith.constant 0 : index
    %c0_1 = arith.constant 0 : index
    %3 = vector.load %arg8[%c0, %c0_1] : memref<16x64xf32, #tpu.memory_space<vmem>>, vector<16x64xf32>
    %c0_2 = arith.constant 0 : index
    %c0_3 = arith.constant 0 : index
    %4 = vector.load %arg5[%c0_2, %c0_3] : memref<64x128xf32, #tpu.memory_space<vmem>>, vector<64x128xf32>
    %cst = arith.constant dense<0.000000e+00> : vector<16x128xf32>
    %5 = tpu.matmul %3, %4, %cst {dimension_numbers = #tpu.dot_dimension_numbers<[1], [0], [0], [1], [0, 0, 1, 1], [], []>} : vector<16x64xf32>, vector<64x128xf32>, vector<16x128xf32> -> vector<16x128xf32>
    %c0_4 = arith.constant 0 : index
    %c0_5 = arith.constant 0 : index
    %6 = vector.load %arg6[%c0_4, %c0_5] : memref<1x128xf32, #tpu.memory_space<vmem>>, vector<1x128xf32>
    %7 = vector.broadcast %6 : vector<1x128xf32> to vector<16x128xf32>
    %8 = arith.addf %5, %7 : vector<16x128xf32>
    %9 = arith.negf %8 : vector<16x128xf32>
    %10 = math.exp %9 : vector<16x128xf32>
    %cst_6 = arith.constant 1.000000e+00 : f32
    %11 = vector.broadcast %cst_6 : f32 to vector<16x128xf32>
    %12 = arith.addf %11, %10 : vector<16x128xf32>
    %13 = arith.divf %11, %12 : vector<16x128xf32>
    %c0_7 = arith.constant 0 : index
    %c0_8 = arith.constant 0 : index
    %14 = vector.load %arg7[%c0_7, %c0_8] : memref<16x128xf32, #tpu.memory_space<vmem>>, vector<16x128xf32>
    tpu.vector_store %arg7[%c0_7, %c0_8], %13 {strides = array<i32>} : memref<16x128xf32, #tpu.memory_space<vmem>>, vector<16x128xf32>,
    return
  }
  func.func @transform_0(%arg0: i32, %arg1: i32) -> (i32, i32) {
    %c0_i32 = arith.constant 0 : i32
    %c0_i32_0 = arith.constant 0 : i32
    return %arg0, %c0_i32 : i32, i32
  }
  func.func @transform_1(%arg0: i32, %arg1: i32) -> (i32, i32) {
    %c0_i32 = arith.constant 0 : i32
    %c0_i32_0 = arith.constant 0 : i32
    %c0_i32_1 = arith.constant 0 : i32
    return %c0_i32, %c0_i32_0 : i32, i32
  }
  func.func @transform_2(%arg0: i32, %arg1: i32) -> (i32, i32) {
    %c0_i32 = arith.constant 0 : i32
    %c0_i32_0 = arith.constant 0 : i32
    %c0_i32_1 = arith.constant 0 : i32
    return %c0_i32, %c0_i32_0 : i32, i32
  }
  func.func @transform_3(%arg0: i32, %arg1: i32) -> (i32, i32) {
    %c0_i32 = arith.constant 0 : i32
    %c0_i32_0 = arith.constant 0 : i32
    return %c0_i32, %arg1 : i32, i32
  }
  func.func @transform_4(%arg0: i32, %arg1: i32) -> (i32, i32) {
    %c0_i32 = arith.constant 0 : i32
    %c0_i32_0 = arith.constant 0 : i32
    return %c0_i32, %arg1 : i32, i32
  }
  func.func @transform_5(%arg0: i32, %arg1: i32) -> (i32, i32) {
    %c0_i32 = arith.constant 0 : i32
    return %arg0, %arg1 : i32, i32
  }
}

</mosaic_0001>

<bundles_post_ra>
// kernel: dyngraph2vec_dec_forward.1
= control target key start
LH: loop header
LB: loop body
LE: loop exit
PB: predicated region body
PF: predicated region fallthrough
CT: control target
= control target key end

     0   :  { %10 = vsyncpa [#allocation4], 0  ;;  %s594_s0 = inlined_call_operand.hbm [shape: f32[16,32], index: 0, kind: input, shape index: {}]   ;;  %s595_s1 = inlined_call_operand.hbm [shape: f32[32,64], index: 1, kind: input, shape index: {}]   ;;  %s596_s2 = inlined_call_operand.vmem [shape: f32[1,64], index: 2, kind: input, shape index: {}]   ;;  %s597_s3 = inlined_call_operand.hbm [shape: f32[64,128], index: 3, kind: input, shape index: {}]   ;;  %s598_s4 = inlined_call_operand.vmem [shape: f32[1,128], index: 4, kind: input, shape index: {}]   ;;  %s599_s5 = inlined_call_operand.hbm [shape: f32[16,128], index: 5, kind: output, shape index: {}]  }
   0x1   :  { %11 = vsyncpa [#allocation7], 0 }
   0x2   :  { %12 = vsyncpa [#allocation5], 0  ;;  %s483_s18 = smov [#allocation6]   ;;  %s484_s20 = smov [#allocation3]  }
   0x3   :  { %s30_s19 = sshll.u32 %s483_s18, 4  ;;  %s18_s21 = sshll.u32 %s484_s20, 4  ;;  %s31_s19 = int_to_ptr.vmem [resolvable:$true] %s30_s19  ;;  %s519_s21 = int_to_ptr.vmem [resolvable:$true] %s18_s21 }
   0x4   :  { %s389_s24 = scalar_lea.hbm %s595_s1, 512 }
   0x5   :  { %p390_p0 = scmp.ne.s32.totalorder %s595_s1, %s389_s24  ;;  %p393_p1 = scmp.lt.u32.totalorder %s389_s24, %s595_s1 }
   0x7   :  { %p395_p2 = pnand %p393_p1, %p390_p0 }
   0x9   :  { %398 = shalt.err (!%p395_p2)
}
   0xa   :  { %s399_s29 = scalar_lea.vmem %s31_s19, 512  ;;  %p404_p4 = scmp.lt.s32.totalorder %s31_s19, %s31_s19 }
   0xb   :  { %p400_p3 = scmp.ne.s32.totalorder %s31_s19, %s399_s29  ;;  %p405_p5 = scmp.lt.s32.totalorder %s399_s29, %s399_s29 }
   0xd   :  { %p406_p6 = por %p405_p5, %p404_p4 }
   0xf   :  { %p407_p7 = pnand %p406_p6, %p400_p3 }
  0x11   :  { %410 = shalt.err (!%p407_p7)
}
  0x12   :  { %s485_s30 = smov 128   ;;  %s486_s6 = smov 8  }
  0x13   :  { %36 = dma.hbm_to_vmem [thread:$0]  %s595_s1, 512, %s31_s19, [#allocation7], %s485_s30, %s485_s30, %s486_s6  }
  0x14   :  { %s411_s11 = scalar_lea.hbm %s594_s0, 256 }
  0x15   :  { %p412_p8 = scmp.ne.s32.totalorder %s594_s0, %s411_s11  ;;  %p415_p9 = scmp.lt.u32.totalorder %s411_s11, %s594_s0 }
  0x17   :  { %p417_p10 = pnand %p415_p9, %p412_p8 }
  0x19   :  { %420 = shalt.err (!%p417_p10)
}
  0x1a   :  { %s421_s16 = scalar_lea.vmem %s519_s21, 256  ;;  %p426_p12 = scmp.lt.s32.totalorder %s519_s21, %s519_s21 }
  0x1b   :  { %p422_p11 = scmp.ne.s32.totalorder %s519_s21, %s421_s16  ;;  %p427_p13 = scmp.lt.s32.totalorder %s421_s16, %s421_s16 }
  0x1d   :  { %p428_p0 = por %p427_p13, %p426_p12 }
  0x1f   :  { %p429_p1 = pnand %p428_p0, %p422_p11 }
  0x21   :  { %432 = shalt.err (!%p429_p1)
}
  0x22   :  { %24 = dma.hbm_to_vmem [thread:$0]  %s594_s0, 256, %s519_s21, [#allocation4], %s485_s30, %s485_s30, %s486_s6  }
  0x23   :  { %s487_s18 = smov [#allocation8]   ;;  %s433_s23 = scalar_lea.hbm %s597_s3, 1024 }
  0x24   :  { %s44_s19 = sshll.u32 %s487_s18, 4  ;;  %p434_p2 = scmp.ne.s32.totalorder %s597_s3, %s433_s23  ;;  %s45_s19 = int_to_ptr.vmem [resolvable:$true] %s44_s19 }
  0x25   :  { %p437_p3 = scmp.lt.u32.totalorder %s433_s23, %s597_s3 }
  0x27   :  { %p439_p4 = pnand %p437_p3, %p434_p2 }
  0x29   :  { %442 = shalt.err (!%p439_p4)
}
  0x2a   :  { %s443_s28 = scalar_lea.vmem %s45_s19, 1024  ;;  %p448_p6 = scmp.lt.s32.totalorder %s45_s19, %s45_s19 }
  0x2b   :  { %p444_p5 = scmp.ne.s32.totalorder %s45_s19, %s443_s28  ;;  %p449_p7 = scmp.lt.s32.totalorder %s443_s28, %s443_s28 }
  0x2d   :  { %p450_p8 = por %p449_p7, %p448_p6 }
  0x2f   :  { %p451_p9 = pnand %p450_p8, %p444_p5 }
  0x31   :  { %454 = shalt.err (!%p451_p9)
}
  0x32   :  { %50 = dma.hbm_to_vmem [thread:$0]  %s597_s3, 1024, %s45_s19, [#allocation7], %s485_s30, %s485_s30, %s486_s6  }
  0x33   :  { %477 = dma.done.wait [#allocation4], 256  }
  0x34   :  { %478 = vsyncadd [#allocation4], 4294967040 }
  0x35   :  { %479 = dma.done.wait [#allocation7], 1536  }
  0x36   :  { %480 = vsyncadd [#allocation7], 4294965760  ;;  %vm79_vm0 = vcmask 261120   ;;  %v68_v0 = vld [vmem:[#allocation6] sm:$0xff]  ;;  %v69_v1 = vld [vmem:[#allocation6 + $0x8] sm:$0xff]  ;;  %vm163_vm1 = vcmask 523264  }
  0x37   :  { %v70_v2 = vld [vmem:[#allocation6 + $0x10] sm:$0xff]  ;;  %v351_v3 = vpack.c.bf16 %v69_v1, %v68_v0  ;;  %v71_v4 = vld [vmem:[#allocation6 + $0x18] sm:$0xff]  ;;  %v168_v7 = vld [vmem:[#allocation8] sm:$0xff] }
  0x38   :  { %v66_v5 = vld [vmem:[#allocation3] sm:$0xff]  ;;  %v355_v6 = vpack.c.bf16 %v71_v4, %v70_v2  ;;  %v169_v8 = vld [vmem:[#allocation8 + $0x8] sm:$0xff]  ;;  %v67_v10 = vld [vmem:[#allocation3 + $0x8] sm:$0xff] }
  0x39   :  { %329 = vmatprep.mubr.msk.f32.mxu0 %vm79_vm0, %v66_v5  ;;  %352 = vmatprep.subr.bf16.mxu0 %v351_v3  ;;  %v359_v9 = vpack.c.bf16 %v169_v8, %v168_v7  ;;  %v170_v11 = vld [vmem:[#allocation8 + $0x10] sm:$0xff]  ;;  %v171_v12 = vld [vmem:[#allocation8 + $0x18] sm:$0xff]  ;;  %v172_v14 = vld [vmem:[#allocation8 + $0x20] sm:$0xff] }
  0x3a   :  { %354 = vmatpush3.bf16.msra.mxu0 %v351_v3  ;;  %v363_v13 = vpack.c.bf16 %v171_v12, %v170_v11  ;;  %v173_v15 = vld [vmem:[#allocation8 + $0x28] sm:$0xff]  ;;  %v174_v16 = vld [vmem:[#allocation8 + $0x30] sm:$0xff]  ;;  %v175_v18 = vld [vmem:[#allocation8 + $0x38] sm:$0xff] }
  0x3b   :  { %356 = vmatprep.subr.bf16.mxu0 %v355_v6  ;;  %360 = vmatprep.subr.bf16.mxu1 %v359_v9  ;;  %v367_v17 = vpack.c.bf16 %v173_v15, %v172_v14  ;;  %v371_v19 = vpack.c.bf16 %v175_v18, %v174_v16  ;;  %v297_v20 = vld [vmem:[%s596_s2] ss:$0 sm:$0xff]  ;;  %s488_s2 = smov [#allocation9]  }
  0x3c   :  { %362 = vmatpush3.bf16.msra.mxu1 %v359_v9  ;;  %v300_v29 = vld [vmem:[%s598_s4] ss:$0 sm:$0xff]  ;;  %s284_s9 = sshll.u32 %s488_s2, 4  ;;  %s285_s9 = int_to_ptr.vmem [resolvable:$true] %s284_s9 }
  0x3d   :  { %364 = vmatprep.subr.bf16.mxu1 %v363_v13  ;;  %s455_s4 = scalar_lea.vmem %s285_s9, 256  ;;  %p460_p11 = scmp.lt.s32.totalorder %s285_s9, %s285_s9 }
  0x3e   :  { %358 = vmatpush3.bf16.msra.mxu0 %v355_v6  ;;  %p456_p10 = scmp.ne.s32.totalorder %s285_s9, %s455_s4  ;;  %p461_p12 = scmp.lt.s32.totalorder %s455_s4, %s455_s4 }
  0x40   :  { %366 = vmatpush3.bf16.msra.mxu1 %v363_v13  ;;  %p462_p13 = por %p461_p12, %p460_p11 }
  0x41   :  { %330 = vmatmul.mubr.msk.f32.vlgmr.msra.gmra.mrb[0].mxu0 %vm79_vm0, %v67_v10  ;;  %368 = vmatprep.subr.bf16.mxu1 %v367_v17 }
  0x42   :  { %p463_p0 = pnand %p462_p13, %p456_p10 }
  0x44   :  { %370 = vmatpush3.bf16.msra.mxu1 %v367_v17 }
  0x45   :  { %372 = vmatprep.subr.bf16.mxu1 %v371_v19 }
  0x48   :  { %374 = vmatpush3.bf16.msra.mxu1 %v371_v19 }
 0x114   :  { %v331_v21 = vpop.f32.mrb[0].mxu0 }
 0x115   :  { %v158_v22 = vadd.f32 %v331_v21, %v297_v20  ;;  %v152_v23 = vpop.f32.mrb[1].mxu0 }
 0x116   :  { %v153_v24 = vadd.f32 %v297_v20, %v152_v23 }
 0x117   :  { %v162_v25 = vmax.f32 %v158_v22, 0.0 }
 0x118   :  { %v161_v26 = vmax.f32 %v153_v24, 0.0 }
 0x119   :  { %165 = vst.msk [vmem:[#allocation2 + $0x8] sm:$0xff] %vm163_vm1, %v162_v25 }
 0x11a   :  { %164 = vst.msk [vmem:[#allocation2] sm:$0xff] %vm163_vm1, %v161_v26 }
 0x120   :  { %v167_v28 = vld [vmem:[#allocation2 + $0x8] sm:$0xff] }
 0x121   :  { %v166_v27 = vld [vmem:[#allocation2] sm:$0xff] }
 0x122   :  { %348 = vmatprep.mubr.msk.f32.mxu1 %vm163_vm1, %v166_v27 }
 0x123   :  { %349 = vmatmul.mubr.msk.f32.vlgmr.msra.gmra.mrb[0].mxu1 %vm163_vm1, %v167_v28 }
 0x1f6   :  { %v350_v30 = vpop.f32.mrb[0].mxu1 }
 0x1f7   :  { %v262_v31 = vadd.f32 %v350_v30, %v300_v29  ;;  %v256_v32 = vpop.f32.mrb[1].mxu1 }
 0x1f8   :  { %v257_v33 = vadd.f32 %v300_v29, %v256_v32 }
 0x1f9   :  { %v304_v34 = vmul.f32 -1.442695, %v262_v31 }
 0x1fa   :  { %v303_v35 = vmul.f32 -1.442695, %v257_v33 }
 0x1fb   :  { %381 = vpow2.f32 %v304_v34 }
 0x1fc   :  { %383 = vpow2.f32 %v303_v35 }
 0x205   :  { %v382_v36 = vpop.eup %381 }
 0x206   :  { %v384_v37 = vpop.eup %383  ;;  %v272_v38 = vadd.f32 1.0, %v382_v36 }
 0x207   :  { %v271_v39 = vadd.f32 1.0, %v384_v37 }
 0x208   :  { %385 = vrcp.f32 %v272_v38 }
 0x209   :  { %387 = vrcp.f32 %v271_v39 }
 0x212   :  { %v386_v40 = vpop.eup %385 }
 0x213   :  { %v388_v41 = vpop.eup %387  ;;  %278 = vst [vmem:[#allocation9 + $0x8] sm:$0xff] %v386_v40 }
 0x214   :  { %277 = vst [vmem:[#allocation9] sm:$0xff] %v388_v41 }
 0x215   :  { %466 = shalt.err (!%p463_p0)
}
 0x216   :  { %s467_s12 = scalar_lea.hbm %s599_s5, 256 }
 0x217   :  { %p468_p1 = scmp.ne.s32.totalorder %s599_s5, %s467_s12  ;;  %p471_p2 = scmp.lt.u32.totalorder %s467_s12, %s599_s5 }
 0x219   :  { %p473_p3 = pnand %p471_p2, %p468_p1 }
 0x21b   :  { %476 = shalt.err (!%p473_p3)
}
 0x21c   :  { %290 = dma.vmem_to_hbm [thread:$0]  %s285_s9, 256, %s599_s5, [#allocation5], %s485_s30, %s485_s30, %s486_s6  }
 0x21d   :  { %481 = dma.done.wait [#allocation5], 256  }
 0x21e   :  { %482 = vsyncadd [#allocation5], 4294967040 }
 0x21f   :  { %294 = vsyncpa [#allocation4], 1 }
 0x220   :  { %295 = vsyncpa [#allocation7], 1 }
 0x221   :  { %296 = vsyncpa [#allocation5], 1 }

</bundles_post_ra>
